<compile_context>
chip_gen: v7x
topology: tpu7x:2x2x1
jax: 0.10.0
libtpu: 0.0.40
codegen_flags: <defaults>
</compile_context>

<pallas_src>
import jax
import jax.numpy as jnp
from jax.experimental import pallas as pl
from jax.experimental.pallas import tpu as pltpu

LANE = 128      # vreg lane width
SUBLANE = 8     # vreg sublane count (f32)


def _round_up(x, m):
    return (x + m - 1) // m * m


def _dqn_kernel(x_ref, w1_ref, b1_ref, w2_ref, b2_ref, w3_ref, b3_ref, o_ref):
    # In-kernel f32 -> bf16 cast of the activations (free on VPU slack); the
    # sigmoid affine is pre-folded into the weights, so only tanh remains (EUP).
    x = x_ref[...].astype(jnp.bfloat16)
    t1 = jnp.tanh(jnp.dot(x, w1_ref[...],
                          preferred_element_type=jnp.float32) + b1_ref[...])
    t2 = jnp.tanh(jnp.dot(t1.astype(jnp.bfloat16), w2_ref[...],
                          preferred_element_type=jnp.float32) + b2_ref[...])
    o_ref[...] = jnp.dot(t2.astype(jnp.bfloat16), w3_ref[...],
                         preferred_element_type=jnp.float32) + b3_ref[...]


def init_params(key, input_dim, fc1_dims, fc2_dims, n_actions):
    """nn.Linear-style uniform(-1/sqrt(in), 1/sqrt(in)) init.
    Weights stored as (in, out) so the forward computes x @ W + b."""
    ks = jax.random.split(key, 6)

    def linear(kw, kb, fan_in, fan_out):
        bound = 1.0 / jnp.sqrt(jnp.float32(fan_in))
        w = jax.random.uniform(kw, (fan_in, fan_out), jnp.float32, -bound, bound)
        b = jax.random.uniform(kb, (1, fan_out), jnp.float32, -bound, bound)
        return w, b

    w1, b1 = linear(ks[0], ks[1], input_dim, fc1_dims)
    w2, b2 = linear(ks[2], ks[3], fc1_dims, fc2_dims)
    w3, b3 = linear(ks[4], ks[5], fc2_dims, n_actions)
    return {"w1": w1, "b1": b1, "w2": w2, "b2": b2, "w3": w3, "b3": b3}


def prepare_params(params):
    """One-time layout prep.

    * Fold sigmoid(z) = 0.5*tanh(0.5*z) + 0.5 into the weights (exact):
        t1  = tanh(x  @ (0.5 W1)  + 0.5 b1)
        t2  = tanh(t1 @ (0.25 W2) + 0.5*(b2 + 0.5*colsum(W2)))
        out =      t2 @ (0.5 W3)  + (b3 + 0.5*colsum(W3))
      (colsums are over the real, unpadded rows; padded rows are zero anyway.)
    * Zero-pad hidden widths to multiples of 128 (lane-dense MXU passes); the
      output head is padded only to 8 lanes (narrow writeback slab).
    * Cast weight matrices to bf16 (MXU-native; power-of-two scales are exact),
      biases stay f32.
    """
    w1, b1 = params["w1"], params["b1"]
    w2, b2 = params["w2"], params["b2"]
    w3, b3 = params["w3"], params["b3"]
    d_in, f1 = w1.shape
    f2 = w2.shape[1]
    na = w3.shape[1]
    f1p = _round_up(f1, LANE)
    f2p = _round_up(f2, LANE)
    nap = _round_up(na, SUBLANE)

    # Affine fold (computed on the unpadded params, in f32).
    w1f = 0.5 * w1
    b1f = 0.5 * b1
    w2f = 0.25 * w2
    b2f = 0.5 * (b2 + 0.5 * jnp.sum(w2, axis=0, keepdims=True))
    w3f = 0.5 * w3
    b3f = b3 + 0.5 * jnp.sum(w3, axis=0, keepdims=True)

    def pad2(a, rows, cols):
        return jnp.pad(a, ((0, rows - a.shape[0]), (0, cols - a.shape[1])))

    return {
        "w1": pad2(w1f, d_in, f1p).astype(jnp.bfloat16),
        "b1": pad2(b1f, 1, f1p),
        "w2": pad2(w2f, f1p, f2p).astype(jnp.bfloat16),
        "b2": pad2(b2f, 1, f2p),
        "w3": pad2(w3f, f2p, nap).astype(jnp.bfloat16),
        "b3": pad2(b3f, 1, nap),
        "n_actions": na,
    }


def _batch_semantics(num_tiles):
    if num_tiles <= 1:
        return ("arbitrary",)
    try:
        kind = jax.devices()[0].device_kind.lower()
    except Exception:
        kind = ""
    if "v7" in kind:
        # v7x has 2 TensorCores per chip; core_parallel actually splits the
        # batch tiles across both TCs (plain "parallel" is codegen-neutral).
        return (pltpu.CORE_PARALLEL,)
    return ("parallel",)


def dqn_forward(state, prep):
    """state: (batch, input_dim) float32; prep: output of prepare_params."""
    w1, b1 = prep["w1"], prep["b1"]
    w2, b2 = prep["w2"], prep["b2"]
    w3, b3 = prep["w3"], prep["b3"]
    n_actions = prep["n_actions"]

    batch, d_in = state.shape
    nap = w3.shape[1]

    # Batch tiling: one VMEM-resident block for small/medium batches; 512-row
    # tiles otherwise (big enough to amortize the ~0.35 us per-grid-step cost,
    # tiny VMEM footprint: ~32 KB x + ~16 KB out per buffer).
    if batch <= 512:
        bp = _round_up(batch, SUBLANE)
        tb = bp
    else:
        tb = 512
        bp = _round_up(batch, tb)
    num_tiles = bp // tb

    x = state
    if bp != batch:
        x = jnp.pad(x, ((0, bp - batch), (0, 0)))
    # x stays f32 here; the bf16 cast happens inside the kernel.

    # Weights/biases: full block, constant index_map -> stay resident in VMEM
    # while the activation DMA pipelines across batch tiles.
    const = lambda a: pl.BlockSpec(a.shape, lambda i: (0, 0))

    out = pl.pallas_call(
        _dqn_kernel,
        out_shape=jax.ShapeDtypeStruct((bp, nap), jnp.float32),
        grid=(num_tiles,),
        in_specs=[pl.BlockSpec((tb, d_in), lambda i: (i, 0)),
                  const(w1), const(b1),
                  const(w2), const(b2),
                  const(w3), const(b3)],
        out_specs=pl.BlockSpec((tb, nap), lambda i: (i, 0)),
        compiler_params=pltpu.CompilerParams(
            dimension_semantics=_batch_semantics(num_tiles)),
    )(x, w1, b1, w2, b2, w3, b3)

    return out[:batch, :n_actions]


def _reference(state, p):
    h1 = jax.nn.sigmoid(state @ p["w1"] + p["b1"])
    h2 = jax.nn.sigmoid(h1 @ p["w2"] + p["b2"])
    return h2 @ p["w3"] + p["b3"]


if __name__ == "__main__":
    # Shapes consistent with DeepQNetwork(lr, input_dims=(16,), fc1=64, fc2=32, n_actions=4)
    batch, input_dim, fc1_dims, fc2_dims, n_actions = 8, 16, 64, 32, 4

    key = jax.random.PRNGKey(0)
    kx, kp, kx2 = jax.random.split(key, 3)
    state = jax.random.normal(kx, (batch, input_dim), jnp.float32)
    params = init_params(kp, input_dim, fc1_dims, fc2_dims, n_actions)
    prep = prepare_params(params)

    # Small (inference-sized) batch: single-block path.
    actions = jax.block_until_ready(dqn_forward(state, prep))
    ref = _reference(state, params)
    assert actions.shape == (batch, n_actions)
    # bf16 matmul operands -> relaxed tolerance vs the pure-f32 reference.
    assert jnp.allclose(actions, ref, atol=3e-2, rtol=3e-2), "mismatch vs reference (small batch)"

    # Larger batch: exercises the 512-row tiled / parallel-grid path.
    big_batch = 1024
    state_big = jax.random.normal(kx2, (big_batch, input_dim), jnp.float32)
    actions_big = jax.block_until_ready(dqn_forward(state_big, prep))
    ref_big = _reference(state_big, params)
    assert actions_big.shape == (big_batch, n_actions)
    assert jnp.allclose(actions_big, ref_big, atol=3e-2, rtol=3e-2), "mismatch vs reference (big batch)"

    print("KERNEL_OK")
</pallas_src>

<mosaic_0001>
module attributes {stable_mosaic.version = 11 : i64} {
  func.func @_dqn_kernel(%arg0: i32, %arg1: memref<8x16xf32, #tpu.memory_space<vmem>>, %arg2: memref<16x128xbf16, #tpu.memory_space<vmem>>, %arg3: memref<1x128xf32, #tpu.memory_space<vmem>>, %arg4: memref<128x128xbf16, #tpu.memory_space<vmem>>, %arg5: memref<1x128xf32, #tpu.memory_space<vmem>>, %arg6: memref<128x8xbf16, #tpu.memory_space<vmem>>, %arg7: memref<1x8xf32, #tpu.memory_space<vmem>>, %arg8: memref<8x8xf32, #tpu.memory_space<vmem>>) attributes {dimension_semantics = [#tpu.dimension_semantics<arbitrary>], iteration_bounds = array<i64: 1>, scalar_prefetch = 0 : i64, scratch_operands = 0 : i64, tpu.core_type = #tpu.core_type<tc>, window_params = [{transform_indices = @transform_0, window_bounds = array<i64: 8, 16>}, {pipeline_mode = #tpu.pipeline_mode<synchronous>, transform_indices = @transform_1, window_bounds = array<i64: 16, 128>}, {pipeline_mode = #tpu.pipeline_mode<synchronous>, transform_indices = @transform_2, window_bounds = array<i64: 1, 128>}, {pipeline_mode = #tpu.pipeline_mode<synchronous>, transform_indices = @transform_3, window_bounds = array<i64: 128, 128>}, {pipeline_mode = #tpu.pipeline_mode<synchronous>, transform_indices = @transform_4, window_bounds = array<i64: 1, 128>}, {pipeline_mode = #tpu.pipeline_mode<synchronous>, transform_indices = @transform_5, window_bounds = array<i64: 128, 8>}, {pipeline_mode = #tpu.pipeline_mode<synchronous>, transform_indices = @transform_6, window_bounds = array<i64: 1, 8>}, {transform_indices = @transform_7, window_bounds = array<i64: 8, 8>}]} {
    %c0 = arith.constant 0 : index
    %c0_0 = arith.constant 0 : index
    %0 = vector.load %arg1[%c0, %c0_0] : memref<8x16xf32, #tpu.memory_space<vmem>>, vector<8x16xf32>
    %1 = arith.truncf %0 : vector<8x16xf32> to vector<8x16xbf16>
    %c0_1 = arith.constant 0 : index
    %c0_2 = arith.constant 0 : index
    %2 = vector.load %arg2[%c0_1, %c0_2] : memref<16x128xbf16, #tpu.memory_space<vmem>>, vector<16x128xbf16>
    %cst = arith.constant dense<0.000000e+00> : vector<8x128xf32>
    %3 = tpu.matmul %1, %2, %cst {dimension_numbers = #tpu.dot_dimension_numbers<[1], [0], [0], [1], [0, 0, 1, 1], [], []>} : vector<8x16xbf16>, vector<16x128xbf16>, vector<8x128xf32> -> vector<8x128xf32>
    %c0_3 = arith.constant 0 : index
    %c0_4 = arith.constant 0 : index
    %4 = vector.load %arg3[%c0_3, %c0_4] : memref<1x128xf32, #tpu.memory_space<vmem>>, vector<1x128xf32>
    %5 = vector.broadcast %4 : vector<1x128xf32> to vector<8x128xf32>
    %6 = arith.addf %3, %5 : vector<8x128xf32>
    %7 = math.tanh %6 : vector<8x128xf32>
    %8 = arith.truncf %7 : vector<8x128xf32> to vector<8x128xbf16>
    %c0_5 = arith.constant 0 : index
    %c0_6 = arith.constant 0 : index
    %9 = vector.load %arg4[%c0_5, %c0_6] : memref<128x128xbf16, #tpu.memory_space<vmem>>, vector<128x128xbf16>
    %cst_7 = arith.constant dense<0.000000e+00> : vector<8x128xf32>
    %10 = tpu.matmul %8, %9, %cst_7 {dimension_numbers = #tpu.dot_dimension_numbers<[1], [0], [0], [1], [0, 0, 1, 1], [], []>} : vector<8x128xbf16>, vector<128x128xbf16>, vector<8x128xf32> -> vector<8x128xf32>
    %c0_8 = arith.constant 0 : index
    %c0_9 = arith.constant 0 : index
    %11 = vector.load %arg5[%c0_8, %c0_9] : memref<1x128xf32, #tpu.memory_space<vmem>>, vector<1x128xf32>
    %12 = vector.broadcast %11 : vector<1x128xf32> to vector<8x128xf32>
    %13 = arith.addf %10, %12 : vector<8x128xf32>
    %14 = math.tanh %13 : vector<8x128xf32>
    %15 = arith.truncf %14 : vector<8x128xf32> to vector<8x128xbf16>
    %c0_10 = arith.constant 0 : index
    %c0_11 = arith.constant 0 : index
    %16 = vector.load %arg6[%c0_10, %c0_11] : memref<128x8xbf16, #tpu.memory_space<vmem>>, vector<128x8xbf16>
    %cst_12 = arith.constant dense<0.000000e+00> : vector<8x8xf32>
    %17 = tpu.matmul %15, %16, %cst_12 {dimension_numbers = #tpu.dot_dimension_numbers<[1], [0], [0], [1], [0, 0, 1, 1], [], []>} : vector<8x128xbf16>, vector<128x8xbf16>, vector<8x8xf32> -> vector<8x8xf32>
    %c0_13 = arith.constant 0 : index
    %c0_14 = arith.constant 0 : index
    %18 = vector.load %arg7[%c0_13, %c0_14] : memref<1x8xf32, #tpu.memory_space<vmem>>, vector<1x8xf32>
    %19 = vector.broadcast %18 : vector<1x8xf32> to vector<8x8xf32>
    %20 = arith.addf %17, %19 : vector<8x8xf32>
    %c0_15 = arith.constant 0 : index
    %c0_16 = arith.constant 0 : index
    %21 = vector.load %arg8[%c0_15, %c0_16] : memref<8x8xf32, #tpu.memory_space<vmem>>, vector<8x8xf32>
    tpu.vector_store %arg8[%c0_15, %c0_16], %20 {strides = array<i32>} : memref<8x8xf32, #tpu.memory_space<vmem>>, vector<8x8xf32>,
    return
  }
  func.func @transform_0(%arg0: i32) -> (i32, i32) {
    %c0_i32 = arith.constant 0 : i32
    %c0_i32_0 = arith.constant 0 : i32
    return %arg0, %c0_i32 : i32, i32
  }
  func.func @transform_1(%arg0: i32) -> (i32, i32) {
    %c0_i32 = arith.constant 0 : i32
    %c0_i32_0 = arith.constant 0 : i32
    %c0_i32_1 = arith.constant 0 : i32
    return %c0_i32, %c0_i32_0 : i32, i32
  }
  func.func @transform_2(%arg0: i32) -> (i32, i32) {
    %c0_i32 = arith.constant 0 : i32
    %c0_i32_0 = arith.constant 0 : i32
    %c0_i32_1 = arith.constant 0 : i32
    return %c0_i32, %c0_i32_0 : i32, i32
  }
  func.func @transform_3(%arg0: i32) -> (i32, i32) {
    %c0_i32 = arith.constant 0 : i32
    %c0_i32_0 = arith.constant 0 : i32
    %c0_i32_1 = arith.constant 0 : i32
    return %c0_i32, %c0_i32_0 : i32, i32
  }
  func.func @transform_4(%arg0: i32) -> (i32, i32) {
    %c0_i32 = arith.constant 0 : i32
    %c0_i32_0 = arith.constant 0 : i32
    %c0_i32_1 = arith.constant 0 : i32
    return %c0_i32, %c0_i32_0 : i32, i32
  }
  func.func @transform_5(%arg0: i32) -> (i32, i32) {
    %c0_i32 = arith.constant 0 : i32
    %c0_i32_0 = arith.constant 0 : i32
    %c0_i32_1 = arith.constant 0 : i32
    return %c0_i32, %c0_i32_0 : i32, i32
  }
  func.func @transform_6(%arg0: i32) -> (i32, i32) {
    %c0_i32 = arith.constant 0 : i32
    %c0_i32_0 = arith.constant 0 : i32
    %c0_i32_1 = arith.constant 0 : i32
    return %c0_i32, %c0_i32_0 : i32, i32
  }
  func.func @transform_7(%arg0: i32) -> (i32, i32) {
    %c0_i32 = arith.constant 0 : i32
    %c0_i32_0 = arith.constant 0 : i32
    return %arg0, %c0_i32 : i32, i32
  }
}

</mosaic_0001>

<bundles_post_ra>
// kernel: tpu_custom_call.1
= control target key start
LH: loop header
LB: loop body
LE: loop exit
PB: predicated region body
PF: predicated region fallthrough
CT: control target
= control target key end

     0   :  { %12 = vsyncpa [#allocation3], 0  ;;  %s661_s0 = inlined_call_operand.vmem [shape: f32[8,16], index: 0, kind: input, shape index: {}]   ;;  %s662_s1 = inlined_call_operand.hbm [shape: bf16[16,128], index: 1, kind: input, shape index: {}]   ;;  %s663_s2 = inlined_call_operand.vmem [shape: f32[1,128], index: 2, kind: input, shape index: {}]   ;;  %s664_s3 = inlined_call_operand.vmem [shape: bf16[128,128], index: 3, kind: input, shape index: {}]   ;;  %s665_s4 = inlined_call_operand.vmem [shape: f32[1,128], index: 4, kind: input, shape index: {}]   ;;  %s666_s5 = inlined_call_operand.vmem [shape: bf16[128,8], index: 5, kind: input, shape index: {}]   ;;  %s667_s6 = inlined_call_operand.vmem [shape: f32[1,8], index: 6, kind: input, shape index: {}]   ;;  %s668_s7 = inlined_call_operand.hbm [shape: f32[8,8], index: 7, kind: output, shape index: {}]  }
   0x1   :  { %13 = vsyncpa [#allocation4], 0  ;;  %s508_s24 = smov [#allocation2]   ;;  %s460_s28 = scalar_lea.hbm %s662_s1, 128 }
   0x2   :  { %s21_s25 = sshll.u32 %s508_s24, 4  ;;  %p461_p0 = scmp.ne.s32.totalorder %s662_s1, %s460_s28  ;;  %s22_s25 = int_to_ptr.vmem [resolvable:$true] %s21_s25 }
   0x3   :  { %p464_p1 = scmp.lt.u32.totalorder %s460_s28, %s662_s1 }
   0x5   :  { %p466_p2 = pnand %p464_p1, %p461_p0 }
   0x7   :  { %469 = shalt.err (!%p466_p2)
}
   0x8   :  { %s470_s10 = scalar_lea.vmem %s22_s25, 128  ;;  %p475_p4 = scmp.lt.s32.totalorder %s22_s25, %s22_s25 }
   0x9   :  { %p471_p3 = scmp.ne.s32.totalorder %s22_s25, %s470_s10  ;;  %p476_p5 = scmp.lt.s32.totalorder %s470_s10, %s470_s10 }
   0xb   :  { %p477_p6 = por %p476_p5, %p475_p4 }
   0xd   :  { %p478_p7 = pnand %p477_p6, %p471_p3 }
   0xf   :  { %481 = shalt.err (!%p478_p7)
}
  0x10   :  { %s509_s11 = smov 64   ;;  %s510_s12 = smov 4  }
  0x11   :  { %27 = dma.hbm_to_vmem [thread:$0]  %s662_s1, 128, %s22_s25, [#allocation3], %s509_s11, %s509_s11, %s510_s12  }
  0x12   :  { %504 = dma.done.wait [#allocation3], 128  }
  0x13   :  { %505 = vsyncadd [#allocation3], 4294967168  ;;  %v511_v0 = vmov 0.0   ;;  %vm512_vm0 = vmmov 0   ;;  %v439_v1 = vld [vmem:[#allocation2] sm:$0xff]   ;;  %vm59_vm1 = vcmask 130048  }
  0x14   :  { %387 = vmatprep.subr.bf16.mxu0 %v511_v0  ;;  %389 = vmatprep.mubr.msk.bf16.mxu0 %vm512_vm0, %v511_v0  ;;  %v42_v2 = vld [vmem:[%s661_s0] sm:$0xff]  ;;  %v441_v5 = vld [vmem:[%s664_s3 + $0x8] sm:$0xff]   ;;  %v442_v6 = vld [vmem:[%s664_s3 + $0x10] sm:$0xff]   ;;  %s513_s26 = smov [#allocation5]   ;;  %vm329_vm2 = vcmask 64512  }
  0x15   :  { %393 = vmatprep.subr.bf16.mxu1 %v511_v0  ;;  %409 = vmatprep.mubr.msk.bf16.mxu1 %vm512_vm0, %v511_v0  ;;  %v43_v3 = vpack.c.bf16 %v42_v2, %v42_v2  ;;  %v440_v4 = vld [vmem:[%s664_s3] sm:$0xff]   ;;  %v443_v7 = vld [vmem:[%s664_s3 + $0x18] sm:$0xff]   ;;  %v445_v9 = vld [vmem:[%s664_s3 + $0x28] sm:$0xff]  }
  0x16   :  { %388 = vmatpush3.bf16.msra.mxu0 %v439_v1  ;;  %394 = vmatpush3.bf16.msra.mxu1 %v440_v4  ;;  %v444_v8 = vld [vmem:[%s664_s3 + $0x20] sm:$0xff]   ;;  %v446_v10 = vld [vmem:[%s664_s3 + $0x30] sm:$0xff]   ;;  %v447_v11 = vld [vmem:[%s664_s3 + $0x38] sm:$0xff]  }
  0x17   :  { %413 = vmatprep.subr.bf16.mxu0 %v511_v0  ;;  %395 = vmatprep.subr.bf16.mxu1 %v511_v0  ;;  %v448_v12 = vld [vmem:[%s666_s5] sm:$0xff]   ;;  %v449_v13 = vld [vmem:[%s666_s5 + $0x8] sm:$0xff]   ;;  %v450_v14 = vld [vmem:[%s666_s5 + $0x10] sm:$0xff]  }
  0x18   :  { %v451_v15 = vld [vmem:[%s666_s5 + $0x18] sm:$0xff]   ;;  %v346_v16 = vld [vmem:[%s663_s2] ss:$0 sm:$0xff]  ;;  %v453_v25 = vld [vmem:[%s666_s5 + $0x28] sm:$0xff]  }
  0x19   :  { %390 = vmatmul.mubr.msk.bf16.vlgmr.msra.gmra.mrb[0].mxu0 %vm59_vm1, %v43_v3  ;;  %v452_v24 = vld [vmem:[%s666_s5 + $0x20] sm:$0xff]   ;;  %v454_v26 = vld [vmem:[%s666_s5 + $0x30] sm:$0xff]   ;;  %v455_v27 = vld [vmem:[%s666_s5 + $0x38] sm:$0xff]   ;;  %s337_s5 = sshll.u32 %s513_s26, 4  ;;  %s338_s5 = int_to_ptr.vmem [resolvable:$true] %s337_s5 }
  0x1a   :  { %429 = vmatprep.mubr.msk.bf16.mxu0 %vm512_vm0, %v511_v0  ;;  %396 = vmatpush3.bf16.msra.mxu1 %v441_v5  ;;  %v349_v28 = vld [vmem:[%s665_s4] ss:$0 sm:$0xff]  ;;  %s482_s4 = scalar_lea.vmem %s338_s5, 128  ;;  %p487_p9 = scmp.lt.s32.totalorder %s338_s5, %s338_s5 }
  0x1b   :  { %397 = vmatprep.subr.bf16.mxu1 %v511_v0  ;;  %414 = vmatpush3.bf16.msra.mxu0 %v448_v12  ;;  %v358_v36 = vld [vmem:[%s667_s6] ss:$0 sm:$0xff]  ;;  %p483_p8 = scmp.ne.s32.totalorder %s338_s5, %s482_s4  ;;  %p488_p10 = scmp.lt.s32.totalorder %s482_s4, %s482_s4 }
  0x1c   :  { %415 = vmatprep.subr.bf16.mxu0 %v511_v0 }
  0x1d   :  { %p489_p11 = por %p488_p10, %p487_p9 }
  0x1e   :  { %398 = vmatpush3.bf16.msra.mxu1 %v442_v6 }
  0x1f   :  { %399 = vmatprep.subr.bf16.mxu1 %v511_v0  ;;  %416 = vmatpush3.bf16.msra.mxu0 %v449_v13  ;;  %p490_p12 = pnand %p489_p11, %p483_p8 }
  0x20   :  { %417 = vmatprep.subr.bf16.mxu0 %v511_v0 }
  0x22   :  { %400 = vmatpush3.bf16.msra.mxu1 %v443_v7 }
  0x23   :  { %401 = vmatprep.subr.bf16.mxu1 %v511_v0  ;;  %418 = vmatpush3.bf16.msra.mxu0 %v450_v14 }
  0x24   :  { %419 = vmatprep.subr.bf16.mxu0 %v511_v0 }
  0x26   :  { %402 = vmatpush3.bf16.msra.mxu1 %v444_v8 }
  0x27   :  { %403 = vmatprep.subr.bf16.mxu1 %v511_v0  ;;  %420 = vmatpush3.bf16.msra.mxu0 %v451_v15 }
  0x28   :  { %421 = vmatprep.subr.bf16.mxu0 %v511_v0 }
  0x2a   :  { %404 = vmatpush3.bf16.msra.mxu1 %v445_v9 }
  0x2b   :  { %405 = vmatprep.subr.bf16.mxu1 %v511_v0  ;;  %422 = vmatpush3.bf16.msra.mxu0 %v452_v24 }
  0x2c   :  { %423 = vmatprep.subr.bf16.mxu0 %v511_v0 }
  0x2e   :  { %406 = vmatpush3.bf16.msra.mxu1 %v446_v10 }
  0x2f   :  { %407 = vmatprep.subr.bf16.mxu1 %v511_v0  ;;  %424 = vmatpush3.bf16.msra.mxu0 %v453_v25 }
  0x30   :  { %425 = vmatprep.subr.bf16.mxu0 %v511_v0 }
  0x32   :  { %408 = vmatpush3.bf16.msra.mxu1 %v447_v11 }
  0x33   :  { %426 = vmatpush3.bf16.msra.mxu0 %v454_v26 }
  0x34   :  { %427 = vmatprep.subr.bf16.mxu0 %v511_v0 }
  0x37   :  { %428 = vmatpush3.bf16.msra.mxu0 %v455_v27 }
  0xec   :  { %v97_v17 = vpop.f32.mrb[0].mxu0 }
  0xed   :  { %v98_v18 = vadd.f32 %v346_v16, %v97_v17  ;;  %v391_v19 = vpop.f32.mrb[1].mxu0 }
  0xee   :  { %v100_v20 = vpop.f32.mrb[2].mxu0 }
  0xef   :  { %456 = vtanh.f32 %v98_v18  ;;  %v392_v21 = vpop.f32.mrb[3].mxu0 }
  0xf9   :  { %v457_v22 = vpop.eup %456 }
  0xfa   :  { %v104_v23 = vpack.c.bf16 %v457_v22, %v457_v22 }
  0xfc   :  { %410 = vmatmul.mubr.bf16.vlgmr.msra.gmra.mrb[0].mxu1 %v104_v23 }
 0x1cf   :  { %v210_v29 = vpop.f32.mrb[0].mxu1 }
 0x1d0   :  { %v211_v30 = vadd.f32 %v349_v28, %v210_v29  ;;  %v411_v31 = vpop.f32.mrb[1].mxu1 }
 0x1d1   :  { %v213_v32 = vpop.f32.mrb[2].mxu1 }
 0x1d2   :  { %458 = vtanh.f32 %v211_v30  ;;  %v412_v33 = vpop.f32.mrb[3].mxu1 }
 0x1dc   :  { %v459_v34 = vpop.eup %458 }
 0x1dd   :  { %v217_v35 = vpack.c.bf16 %v459_v34, %v459_v34 }
 0x1df   :  { %430 = vmatmul.mubr.bf16.vlgmr.msra.gmra.mrb[4].mxu0 %v217_v35 }
 0x2b2   :  { %v323_v37 = vpop.f32.mrb[4].mxu0 }
 0x2b3   :  { %v324_v38 = vadd.f32 %v358_v36, %v323_v37  ;;  %v431_v39 = vpop.f32.mrb[5].mxu0 }
 0x2b4   :  { %v326_v40 = vpop.f32.mrb[6].mxu0 }
 0x2b5   :  { %v432_v41 = vpop.f32.mrb[7].mxu0  ;;  %330 = vst.msk [vmem:[#allocation5] sm:$0xff] %vm329_vm2, %v324_v38 }
 0x2b6   :  { %493 = shalt.err (!%p490_p12)
}
 0x2b7   :  { %s494_s6 = scalar_lea.hbm %s668_s7, 128 }
 0x2b8   :  { %p495_p13 = scmp.ne.s32.totalorder %s668_s7, %s494_s6  ;;  %p498_p0 = scmp.lt.u32.totalorder %s494_s6, %s668_s7 }
 0x2ba   :  { %p500_p1 = pnand %p498_p0, %p495_p13 }
 0x2bc   :  { %503 = shalt.err (!%p500_p1)
}
 0x2bd   :  { %340 = dma.vmem_to_hbm [thread:$0]  %s338_s5, 128, %s668_s7, [#allocation4]  }
 0x2be   :  { %506 = dma.done.wait [#allocation4], 128  }
 0x2bf   :  { %507 = vsyncadd [#allocation4], 4294967168 }
 0x2c0   :  { %344 = vsyncpa [#allocation3], 1 }
 0x2c1   :  { %345 = vsyncpa [#allocation4], 1 }

</bundles_post_ra>
